<compile_context>
chip_gen: v6e
topology: v6e:2x2x1
jax: 0.10.0
libtpu: 0.0.40
codegen_flags: <defaults>
</compile_context>

<pallas_src>
import jax
import jax.numpy as jnp
from jax.experimental import pallas as pl
from jax.experimental.pallas import tpu as pltpu

IN_DIM = 28 * 28     # 784
HID_DIM = 14 * 14    # 196
OUT_DIM = 10

HID_PAD = 256        # 2 full 128-lane tiles for hidden activations
OUT_PAD = 128        # lane-dense output block


def _mlp_kernel(x_ref, w1_ref, b1_ref, w2_ref, b2_ref, o_ref):
    # hidden: (TB, 784) @ (784, 256) + (1, 256)
    h = jnp.dot(x_ref[...], w1_ref[...], preferred_element_type=jnp.float32)
    h = h + b1_ref[...]
    # sigmoid = 1 / (1 + exp(-h)); exp + approx reciprocal both land on EUP.
    h = pl.reciprocal(1.0 + jnp.exp(-h), approx=True)
    # output: (TB, 256) @ (256, 128) + (1, 128)   (cols 10..127 are zero)
    out = jnp.dot(h, w2_ref[...], preferred_element_type=jnp.float32)
    out = out + b2_ref[...]
    o_ref[...] = out.astype(o_ref.dtype)


def model_2_forward(x, w1, b1, w2, b2, *, tb_max=512):
    """x: (B, 784); w1: (784, 196); b1: (196,); w2: (196, 10); b2: (10,)."""
    B = x.shape[0]

    # Zero-pad weights/biases: hidden 196->256, output 10->128 (exact no-ops).
    w1p = jnp.zeros((IN_DIM, HID_PAD), jnp.float32).at[:, :HID_DIM].set(w1)
    b1p = jnp.zeros((1, HID_PAD), jnp.float32).at[0, :HID_DIM].set(b1)
    w2p = jnp.zeros((HID_PAD, OUT_PAD), jnp.float32).at[:HID_DIM, :OUT_DIM].set(w2)
    b2p = jnp.zeros((1, OUT_PAD), jnp.float32).at[0, :OUT_DIM].set(b2)

    # Batch tile: multiple of 8 (f32 sublanes), capped so double-buffered x +
    # resident weights fit the v5e 16 MiB scoped-VMEM default with room to spare.
    b_pad8 = ((B + 7) // 8) * 8
    TB = min(tb_max, b_pad8)
    B_pad = ((B + TB - 1) // TB) * TB
    xp = x if B_pad == B else jnp.pad(x, ((0, B_pad - B), (0, 0)))
    grid = (B_pad // TB,)

    weight_bytes = 4 * (IN_DIM * HID_PAD + HID_PAD + HID_PAD * OUT_PAD + OUT_PAD)
    cost = pl.CostEstimate(
        flops=2 * B_pad * (IN_DIM * HID_PAD + HID_PAD * OUT_PAD),
        transcendentals=B_pad * HID_PAD,
        bytes_accessed=B_pad * IN_DIM * 4 + weight_bytes + B_pad * OUT_PAD * 4,
    )

    out = pl.pallas_call(
        _mlp_kernel,
        out_shape=jax.ShapeDtypeStruct((B_pad, OUT_PAD), jnp.float32),
        grid=grid,
        in_specs=[
            pl.BlockSpec((TB, IN_DIM), lambda i: (i, 0)),        # x: tiled over batch
            pl.BlockSpec((IN_DIM, HID_PAD), lambda i: (0, 0)),   # weights stay resident
            pl.BlockSpec((1, HID_PAD), lambda i: (0, 0)),
            pl.BlockSpec((HID_PAD, OUT_PAD), lambda i: (0, 0)),
            pl.BlockSpec((1, OUT_PAD), lambda i: (0, 0)),
        ],
        out_specs=pl.BlockSpec((TB, OUT_PAD), lambda i: (i, 0)),
        compiler_params=pltpu.CompilerParams(
            dimension_semantics=("parallel",),       # v7x: split batch tiles across 2 TCs
            vmem_limit_bytes=32 * 1024 * 1024,
        ),
        cost_estimate=cost,
    )(xp, w1p, b1p, w2p, b2p)

    return out[:B, :OUT_DIM]


def init_params(key):
    """Deterministic init matching nn.Linear's U(-1/sqrt(fan_in), 1/sqrt(fan_in))."""
    k1, k2, k3, k4 = jax.random.split(key, 4)
    bound1 = 1.0 / jnp.sqrt(float(IN_DIM))
    bound2 = 1.0 / jnp.sqrt(float(HID_DIM))
    # Stored already transposed to (in, out) for the kernel.
    w1 = jax.random.uniform(k1, (IN_DIM, HID_DIM), jnp.float32, -bound1, bound1)
    b1 = jax.random.uniform(k2, (HID_DIM,), jnp.float32, -bound1, bound1)
    w2 = jax.random.uniform(k3, (HID_DIM, OUT_DIM), jnp.float32, -bound2, bound2)
    b2 = jax.random.uniform(k4, (OUT_DIM,), jnp.float32, -bound2, bound2)
    return w1, b1, w2, b2


def _reference(x, w1, b1, w2, b2):
    h = jax.nn.sigmoid(jnp.dot(x, w1) + b1)
    return jnp.dot(h, w2) + b2


if __name__ == "__main__":
    key = jax.random.PRNGKey(0)
    kx, kx2, kp = jax.random.split(key, 3)
    w1, b1, w2, b2 = init_params(kp)

    # Small primary check (single batch tile).
    B = 64
    x = jax.random.normal(kx, (B, IN_DIM), dtype=jnp.float32)
    out = jax.block_until_ready(model_2_forward(x, w1, b1, w2, b2))
    ref = _reference(x, w1, b1, w2, b2)
    assert out.shape == (B, OUT_DIM)
    # Tolerance accounts for the EUP approximate reciprocal in the sigmoid
    # (~2^-12 relative error, <~1e-3 after the 196-wide second matmul).
    assert jnp.allclose(out, ref, atol=2e-3, rtol=2e-3)

    # Secondary check: multi-tile grid + batch padding (B not a multiple of TB).
    B2 = 1037
    x2 = jax.random.normal(kx2, (B2, IN_DIM), dtype=jnp.float32)
    out2 = jax.block_until_ready(model_2_forward(x2, w1, b1, w2, b2))
    ref2 = _reference(x2, w1, b1, w2, b2)
    assert out2.shape == (B2, OUT_DIM)
    assert jnp.allclose(out2, ref2, atol=2e-3, rtol=2e-3)

    print("KERNEL_OK")
</pallas_src>

<mosaic_0001>
module attributes {stable_mosaic.version = 11 : i64} {
  func.func @_mlp_kernel(%arg0: i32, %arg1: memref<64x784xf32, #tpu.memory_space<vmem>>, %arg2: memref<784x256xf32, #tpu.memory_space<vmem>>, %arg3: memref<1x256xf32, #tpu.memory_space<vmem>>, %arg4: memref<256x128xf32, #tpu.memory_space<vmem>>, %arg5: memref<1x128xf32, #tpu.memory_space<vmem>>, %arg6: memref<64x128xf32, #tpu.memory_space<vmem>>) attributes {dimension_semantics = [#tpu.dimension_semantics<parallel>], iteration_bounds = array<i64: 1>, scalar_prefetch = 0 : i64, scratch_operands = 0 : i64, tpu.core_type = #tpu.core_type<tc>, window_params = [{transform_indices = @transform_0, window_bounds = array<i64: 64, 784>}, {pipeline_mode = #tpu.pipeline_mode<synchronous>, transform_indices = @transform_1, window_bounds = array<i64: 784, 256>}, {pipeline_mode = #tpu.pipeline_mode<synchronous>, transform_indices = @transform_2, window_bounds = array<i64: 1, 256>}, {pipeline_mode = #tpu.pipeline_mode<synchronous>, transform_indices = @transform_3, window_bounds = array<i64: 256, 128>}, {pipeline_mode = #tpu.pipeline_mode<synchronous>, transform_indices = @transform_4, window_bounds = array<i64: 1, 128>}, {transform_indices = @transform_5, window_bounds = array<i64: 64, 128>}]} {
    %c0 = arith.constant 0 : index
    %c0_0 = arith.constant 0 : index
    %0 = vector.load %arg1[%c0, %c0_0] : memref<64x784xf32, #tpu.memory_space<vmem>>, vector<64x784xf32>
    %c0_1 = arith.constant 0 : index
    %c0_2 = arith.constant 0 : index
    %1 = vector.load %arg2[%c0_1, %c0_2] : memref<784x256xf32, #tpu.memory_space<vmem>>, vector<784x256xf32>
    %cst = arith.constant dense<0.000000e+00> : vector<64x256xf32>
    %2 = tpu.matmul %0, %1, %cst {dimension_numbers = #tpu.dot_dimension_numbers<[1], [0], [0], [1], [0, 0, 1, 1], [], []>} : vector<64x784xf32>, vector<784x256xf32>, vector<64x256xf32> -> vector<64x256xf32>
    %c0_3 = arith.constant 0 : index
    %c0_4 = arith.constant 0 : index
    %3 = vector.load %arg3[%c0_3, %c0_4] : memref<1x256xf32, #tpu.memory_space<vmem>>, vector<1x256xf32>
    %4 = vector.broadcast %3 : vector<1x256xf32> to vector<64x256xf32>
    %5 = arith.addf %2, %4 : vector<64x256xf32>
    %cst_5 = arith.constant 0.000000e+00 : f32
    %6 = vector.broadcast %cst_5 : f32 to vector<64x256xf32>
    %7 = arith.subf %6, %5 : vector<64x256xf32>
    %8 = math.exp %7 : vector<64x256xf32>
    %cst_6 = arith.constant 1.000000e+00 : f32
    %9 = vector.broadcast %cst_6 : f32 to vector<64x256xf32>
    %10 = arith.addf %9, %8 : vector<64x256xf32>
    %11 = tpu.reciprocal %10 {approx = true} : vector<64x256xf32> -> vector<64x256xf32>
    %c0_7 = arith.constant 0 : index
    %c0_8 = arith.constant 0 : index
    %12 = vector.load %arg4[%c0_7, %c0_8] : memref<256x128xf32, #tpu.memory_space<vmem>>, vector<256x128xf32>
    %cst_9 = arith.constant dense<0.000000e+00> : vector<64x128xf32>
    %13 = tpu.matmul %11, %12, %cst_9 {dimension_numbers = #tpu.dot_dimension_numbers<[1], [0], [0], [1], [0, 0, 1, 1], [], []>} : vector<64x256xf32>, vector<256x128xf32>, vector<64x128xf32> -> vector<64x128xf32>
    %c0_10 = arith.constant 0 : index
    %c0_11 = arith.constant 0 : index
    %14 = vector.load %arg5[%c0_10, %c0_11] : memref<1x128xf32, #tpu.memory_space<vmem>>, vector<1x128xf32>
    %15 = vector.broadcast %14 : vector<1x128xf32> to vector<64x128xf32>
    %16 = arith.addf %13, %15 : vector<64x128xf32>
    %c0_12 = arith.constant 0 : index
    %c0_13 = arith.constant 0 : index
    %17 = vector.load %arg6[%c0_12, %c0_13] : memref<64x128xf32, #tpu.memory_space<vmem>>, vector<64x128xf32>
    tpu.vector_store %arg6[%c0_12, %c0_13], %16 {strides = array<i32>} : memref<64x128xf32, #tpu.memory_space<vmem>>, vector<64x128xf32>,
    return
  }
  func.func @transform_0(%arg0: i32) -> (i32, i32) {
    %c0_i32 = arith.constant 0 : i32
    %c0_i32_0 = arith.constant 0 : i32
    return %arg0, %c0_i32 : i32, i32
  }
  func.func @transform_1(%arg0: i32) -> (i32, i32) {
    %c0_i32 = arith.constant 0 : i32
    %c0_i32_0 = arith.constant 0 : i32
    %c0_i32_1 = arith.constant 0 : i32
    return %c0_i32, %c0_i32_0 : i32, i32
  }
  func.func @transform_2(%arg0: i32) -> (i32, i32) {
    %c0_i32 = arith.constant 0 : i32
    %c0_i32_0 = arith.constant 0 : i32
    %c0_i32_1 = arith.constant 0 : i32
    return %c0_i32, %c0_i32_0 : i32, i32
  }
  func.func @transform_3(%arg0: i32) -> (i32, i32) {
    %c0_i32 = arith.constant 0 : i32
    %c0_i32_0 = arith.constant 0 : i32
    %c0_i32_1 = arith.constant 0 : i32
    return %c0_i32, %c0_i32_0 : i32, i32
  }
  func.func @transform_4(%arg0: i32) -> (i32, i32) {
    %c0_i32 = arith.constant 0 : i32
    %c0_i32_0 = arith.constant 0 : i32
    %c0_i32_1 = arith.constant 0 : i32
    return %c0_i32, %c0_i32_0 : i32, i32
  }
  func.func @transform_5(%arg0: i32) -> (i32, i32) {
    %c0_i32 = arith.constant 0 : i32
    %c0_i32_0 = arith.constant 0 : i32
    return %arg0, %c0_i32 : i32, i32
  }
}

</mosaic_0001>

<bundles_post_ra>
// kernel: tpu_custom_call.1
= control target key start
LH: loop header
LB: loop body
LE: loop exit
PB: predicated region body
PF: predicated region fallthrough
CT: control target
= control target key end

     0   :  { %10 = vsyncpa [#allocation3], 0  ;;  %s1437_s0 = inlined_call_operand.hbm [shape: f32[64,784], index: 0, kind: input, shape index: {}]   ;;  %s1438_s1 = inlined_call_operand.hbm [shape: f32[784,256], index: 1, kind: input, shape index: {}]   ;;  %s1439_s2 = inlined_call_operand.vmem [shape: f32[1,256], index: 2, kind: input, shape index: {}]   ;;  %s1440_s3 = inlined_call_operand.hbm [shape: f32[256,128], index: 3, kind: input, shape index: {}]   ;;  %s1441_s4 = inlined_call_operand.vmem [shape: f32[1,128], index: 4, kind: input, shape index: {}]   ;;  %s1442_s5 = inlined_call_operand.hbm [shape: f32[64,128], index: 5, kind: output, shape index: {}]  }
   0x1   :  { %11 = vsyncpa [#allocation6], 0 }
   0x2   :  { %12 = vsyncpa [#allocation4], 0  ;;  %s1279_s18 = smov [#allocation5]  }
   0x3   :  { %s30_s19 = sshll.u32 %s1279_s18, 4  ;;  %s31_s19 = int_to_ptr.vmem [resolvable:$true] %s30_s19 }
   0x4   :  { %s1201_s20 = scalar_lea.vmem %s31_s19, 25088  ;;  %p1206_p1 = scmp.lt.s32.totalorder %s31_s19, %s31_s19 }
   0x5   :  { %p1202_p0 = scmp.ne.s32.totalorder %s31_s19, %s1201_s20  ;;  %p1207_p2 = scmp.lt.s32.totalorder %s1201_s20, %s1201_s20 }
   0x7   :  { %p1208_p3 = por %p1207_p2, %p1206_p1 }
   0x9   :  { %p1209_p4 = pnand %p1208_p3, %p1202_p0 }
   0xb   :  { %1212 = shalt.err (!%p1209_p4)
}
   0xc   :  { %s1280_s21 = smov 256   ;;  %s1281_s22 = smov 16  }
   0xd   :  { %36 = dma.hbm_to_vmem [thread:$0]  %s1438_s1, 25088, %s31_s19, [#allocation6], %s1280_s21, %s1280_s21, %s1281_s22  }
   0xe   :  { %s1282_s25 = smov [#allocation2]  }
   0xf   :  { %s18_s26 = sshll.u32 %s1282_s25, 4  ;;  %s19_s26 = int_to_ptr.vmem [resolvable:$true] %s18_s26 }
  0x10   :  { %s1221_s27 = scalar_lea.vmem %s19_s26, 7168  ;;  %p1226_p6 = scmp.lt.s32.totalorder %s19_s26, %s19_s26 }
  0x11   :  { %p1222_p5 = scmp.ne.s32.totalorder %s19_s26, %s1221_s27  ;;  %p1227_p7 = scmp.lt.s32.totalorder %s1221_s27, %s1221_s27 }
  0x13   :  { %p1228_p8 = por %p1227_p7, %p1226_p6 }
  0x15   :  { %p1229_p9 = pnand %p1228_p8, %p1222_p5 }
  0x17   :  { %1232 = shalt.err (!%p1229_p9)
}
  0x18   :  { %s1283_s28 = smov 896   ;;  %s1284_s29 = smov 56  }
  0x19   :  { %24 = dma.hbm_to_vmem [thread:$0]  %s1437_s0, 7168, %s19_s26, [#allocation3], %s1283_s28, %s1283_s28, %s1284_s29  }
  0x1a   :  { %s1285_s7 = smov [#allocation7]  }
  0x1b   :  { %s44_s8 = sshll.u32 %s1285_s7, 4  ;;  %s45_s8 = int_to_ptr.vmem [resolvable:$true] %s44_s8 }
  0x1c   :  { %s1241_s1 = scalar_lea.vmem %s45_s8, 4096  ;;  %p1246_p11 = scmp.lt.s32.totalorder %s45_s8, %s45_s8 }
  0x1d   :  { %p1242_p10 = scmp.ne.s32.totalorder %s45_s8, %s1241_s1  ;;  %p1247_p12 = scmp.lt.s32.totalorder %s1241_s1, %s1241_s1 }
  0x1f   :  { %p1248_p13 = por %p1247_p12, %p1246_p11 }
  0x21   :  { %p1249_p0 = pnand %p1248_p13, %p1242_p10 }
  0x23   :  { %1252 = shalt.err (!%p1249_p0)
}
  0x24   :  { %s1286_s9 = smov 128   ;;  %s1287_s10 = smov 8  }
  0x25   :  { %50 = dma.hbm_to_vmem [thread:$0]  %s1440_s3, 4096, %s45_s8, [#allocation6], %s1286_s9, %s1286_s9, %s1287_s10  }
  0x26   :  { %1273 = dma.done.wait [#allocation3], 7168  }
  0x27   :  { %1274 = vsyncadd [#allocation3], 4294960128 }
  0x28   :  { %1275 = dma.done.wait [#allocation6], 29184  }
  0x29   :  { %1276 = vsyncadd [#allocation6], 4294938112  ;;  %v149_v0 = vld [vmem:[#allocation5 + $0xf8] sm:$0xff]  ;;  %v148_v1 = vld [vmem:[#allocation5 + $0xf0] sm:$0xff]  ;;  %vm326_vm0 = vcmask 130048  }
  0x2a   :  { %v147_v2 = vld [vmem:[#allocation5 + $0xe8] sm:$0xff]  ;;  %351 = vmatprep.subr.mxu0 %v149_v0  ;;  %v213_v3 = vld [vmem:[#allocation5 + $0x2f8] sm:$0xff]  ;;  %v146_v4 = vld [vmem:[#allocation5 + $0xe0] sm:$0xff] }
  0x2b   :  { %v212_v5 = vld [vmem:[#allocation5 + $0x2f0] sm:$0xff]  ;;  %352 = vmatpush1.msra.mxu0 %v148_v1  ;;  %464 = vmatprep.subr.mxu1 %v213_v3  ;;  %v145_v6 = vld [vmem:[#allocation5 + $0xd8] sm:$0xff]  ;;  %v211_v7 = vld [vmem:[#allocation5 + $0x2e8] sm:$0xff] }
  0x2c   :  { %353 = vmatprep.subr.mxu0 %v147_v2  ;;  %465 = vmatpush1.msra.mxu1 %v212_v5  ;;  %v144_v8 = vld [vmem:[#allocation5 + $0xd0] sm:$0xff]  ;;  %v210_v9 = vld [vmem:[#allocation5 + $0x2e0] sm:$0xff]  ;;  %v209_v10 = vld [vmem:[#allocation5 + $0x2d8] sm:$0xff] }
  0x2d   :  { %354 = vmatpush1.msra.mxu0 %v146_v4  ;;  %466 = vmatprep.subr.mxu1 %v211_v7  ;;  %v143_v11 = vld [vmem:[#allocation5 + $0xc8] sm:$0xff]  ;;  %v208_v12 = vld [vmem:[#allocation5 + $0x2d0] sm:$0xff]  ;;  %v142_v13 = vld [vmem:[#allocation5 + $0xc0] sm:$0xff] }
  0x2e   :  { %355 = vmatprep.subr.mxu0 %v145_v6  ;;  %467 = vmatpush1.msra.mxu1 %v210_v9  ;;  %v207_v14 = vld [vmem:[#allocation5 + $0x2c8] sm:$0xff]  ;;  %v141_v15 = vld [vmem:[#allocation5 + $0xb8] sm:$0xff]  ;;  %v206_v16 = vld [vmem:[#allocation5 + $0x2c0] sm:$0xff] }
  0x2f   :  { %356 = vmatpush1.msra.mxu0 %v144_v8  ;;  %468 = vmatprep.subr.mxu1 %v209_v10  ;;  %v140_v17 = vld [vmem:[#allocation5 + $0xb0] sm:$0xff]  ;;  %v205_v18 = vld [vmem:[#allocation5 + $0x2b8] sm:$0xff]  ;;  %v139_v19 = vld [vmem:[#allocation5 + $0xa8] sm:$0xff] }
  0x30   :  { %357 = vmatprep.subr.mxu0 %v143_v11  ;;  %469 = vmatpush1.msra.mxu1 %v208_v12  ;;  %v204_v20 = vld [vmem:[#allocation5 + $0x2b0] sm:$0xff]  ;;  %v138_v21 = vld [vmem:[#allocation5 + $0xa0] sm:$0xff]  ;;  %v203_v22 = vld [vmem:[#allocation5 + $0x2a8] sm:$0xff] }
  0x31   :  { %358 = vmatpush1.msra.mxu0 %v142_v13  ;;  %470 = vmatprep.subr.mxu1 %v207_v14  ;;  %v137_v23 = vld [vmem:[#allocation5 + $0x98] sm:$0xff]  ;;  %v202_v24 = vld [vmem:[#allocation5 + $0x2a0] sm:$0xff]  ;;  %v136_v25 = vld [vmem:[#allocation5 + $0x90] sm:$0xff] }
  0x32   :  { %359 = vmatprep.subr.mxu0 %v141_v15  ;;  %471 = vmatpush1.msra.mxu1 %v206_v16  ;;  %v201_v26 = vld [vmem:[#allocation5 + $0x298] sm:$0xff]  ;;  %v135_v27 = vld [vmem:[#allocation5 + $0x88] sm:$0xff]  ;;  %v200_v28 = vld [vmem:[#allocation5 + $0x290] sm:$0xff] }
  0x33   :  { %360 = vmatpush1.msra.mxu0 %v140_v17  ;;  %472 = vmatprep.subr.mxu1 %v205_v18  ;;  %v134_v29 = vld [vmem:[#allocation5 + $0x80] sm:$0xff]  ;;  %v199_v30 = vld [vmem:[#allocation5 + $0x288] sm:$0xff]  ;;  %v133_v31 = vld [vmem:[#allocation5 + $0x78] sm:$0xff] }
  0x34   :  { %361 = vmatprep.subr.mxu0 %v139_v19  ;;  %473 = vmatpush1.msra.mxu1 %v204_v20  ;;  %v198_v32 = vld [vmem:[#allocation5 + $0x280] sm:$0xff]  ;;  %v132_v33 = vld [vmem:[#allocation5 + $0x70] sm:$0xff]  ;;  %v197_v34 = vld [vmem:[#allocation5 + $0x278] sm:$0xff] }
  0x35   :  { %362 = vmatpush1.msra.mxu0 %v138_v21  ;;  %474 = vmatprep.subr.mxu1 %v203_v22  ;;  %v131_v35 = vld [vmem:[#allocation5 + $0x68] sm:$0xff]  ;;  %v196_v36 = vld [vmem:[#allocation5 + $0x270] sm:$0xff]  ;;  %v130_v37 = vld [vmem:[#allocation5 + $0x60] sm:$0xff] }
  0x36   :  { %363 = vmatprep.subr.mxu0 %v137_v23  ;;  %475 = vmatpush1.msra.mxu1 %v202_v24  ;;  %v195_v38 = vld [vmem:[#allocation5 + $0x268] sm:$0xff]  ;;  %v129_v39 = vld [vmem:[#allocation5 + $0x58] sm:$0xff]  ;;  %v194_v40 = vld [vmem:[#allocation5 + $0x260] sm:$0xff] }
  0x37   :  { %364 = vmatpush1.msra.mxu0 %v136_v25  ;;  %476 = vmatprep.subr.mxu1 %v201_v26  ;;  %v128_v41 = vld [vmem:[#allocation5 + $0x50] sm:$0xff]  ;;  %v193_v42 = vld [vmem:[#allocation5 + $0x258] sm:$0xff]  ;;  %v127_v43 = vld [vmem:[#allocation5 + $0x48] sm:$0xff] }
  0x38   :  { %365 = vmatprep.subr.mxu0 %v135_v27  ;;  %477 = vmatpush1.msra.mxu1 %v200_v28  ;;  %v192_v44 = vld [vmem:[#allocation5 + $0x250] sm:$0xff]  ;;  %v126_v45 = vld [vmem:[#allocation5 + $0x40] sm:$0xff]  ;;  %v191_v46 = vld [vmem:[#allocation5 + $0x248] sm:$0xff] }
  0x39   :  { %366 = vmatpush1.msra.mxu0 %v134_v29  ;;  %478 = vmatprep.subr.mxu1 %v199_v30  ;;  %v125_v47 = vld [vmem:[#allocation5 + $0x38] sm:$0xff]  ;;  %v190_v48 = vld [vmem:[#allocation5 + $0x240] sm:$0xff]  ;;  %v124_v49 = vld [vmem:[#allocation5 + $0x30] sm:$0xff] }
  0x3a   :  { %367 = vmatprep.subr.mxu0 %v133_v31  ;;  %479 = vmatpush1.msra.mxu1 %v198_v32  ;;  %v189_v50 = vld [vmem:[#allocation5 + $0x238] sm:$0xff]  ;;  %v123_v51 = vld [vmem:[#allocation5 + $0x28] sm:$0xff]  ;;  %v188_v52 = vld [vmem:[#allocation5 + $0x230] sm:$0xff] }
  0x3b   :  { %368 = vmatpush1.msra.mxu0 %v132_v33  ;;  %480 = vmatprep.subr.mxu1 %v197_v34  ;;  %v122_v53 = vld [vmem:[#allocation5 + $0x20] sm:$0xff]  ;;  %v187_v54 = vld [vmem:[#allocation5 + $0x228] sm:$0xff]  ;;  %v121_v55 = vld [vmem:[#allocation5 + $0x18] sm:$0xff] }
  0x3c   :  { %369 = vmatprep.subr.mxu0 %v131_v35  ;;  %481 = vmatpush1.msra.mxu1 %v196_v36  ;;  %v186_v56 = vld [vmem:[#allocation5 + $0x220] sm:$0xff]  ;;  %v120_v57 = vld [vmem:[#allocation5 + $0x10] sm:$0xff]  ;;  %v185_v58 = vld [vmem:[#allocation5 + $0x218] sm:$0xff] }
  0x3d   :  { %370 = vmatpush1.msra.mxu0 %v130_v37  ;;  %482 = vmatprep.subr.mxu1 %v195_v38  ;;  %v119_v59 = vld [vmem:[#allocation5 + $0x8] sm:$0xff]  ;;  %v184_v60 = vld [vmem:[#allocation5 + $0x210] sm:$0xff]  ;;  %v118_v61 = vld [vmem:[#allocation5] sm:$0xff] }
  0x3e   :  { %371 = vmatprep.subr.mxu0 %v129_v39  ;;  %483 = vmatpush1.msra.mxu1 %v194_v40  ;;  %v183_v62 = vld [vmem:[#allocation5 + $0x208] sm:$0xff]  ;;  %v181_v63 = vld [vmem:[#allocation5 + $0x1f8] sm:$0xff]  ;;  %v182_v0 = vld [vmem:[#allocation5 + $0x200] sm:$0xff] }
  0x3f   :  { %372 = vmatpush1.msra.mxu0 %v128_v41  ;;  %484 = vmatprep.subr.mxu1 %v193_v42  ;;  %v180_v1 = vld [vmem:[#allocation5 + $0x1f0] sm:$0xff]  ;;  %v245_v2 = vld [vmem:[#allocation5 + $0x3f8] sm:$0xff]  ;;  %v179_v3 = vld [vmem:[#allocation5 + $0x1e8] sm:$0xff] }
  0x40   :  { %373 = vmatprep.subr.mxu0 %v127_v43  ;;  %485 = vmatpush1.msra.mxu1 %v192_v44  ;;  %v244_v4 = vld [vmem:[#allocation5 + $0x3f0] sm:$0xff]  ;;  %v178_v5 = vld [vmem:[#allocation5 + $0x1e0] sm:$0xff]  ;;  %v243_v6 = vld [vmem:[#allocation5 + $0x3e8] sm:$0xff] }
  0x41   :  { %374 = vmatpush1.msra.mxu0 %v126_v45  ;;  %486 = vmatprep.subr.mxu1 %v191_v46  ;;  %v177_v7 = vld [vmem:[#allocation5 + $0x1d8] sm:$0xff]  ;;  %v242_v8 = vld [vmem:[#allocation5 + $0x3e0] sm:$0xff]  ;;  %v176_v9 = vld [vmem:[#allocation5 + $0x1d0] sm:$0xff] }
  0x42   :  { %375 = vmatprep.subr.mxu0 %v125_v47  ;;  %487 = vmatpush1.msra.mxu1 %v190_v48  ;;  %v241_v10 = vld [vmem:[#allocation5 + $0x3d8] sm:$0xff]  ;;  %v175_v11 = vld [vmem:[#allocation5 + $0x1c8] sm:$0xff]  ;;  %v240_v12 = vld [vmem:[#allocation5 + $0x3d0] sm:$0xff] }
  0x43   :  { %376 = vmatpush1.msra.mxu0 %v124_v49  ;;  %488 = vmatprep.subr.mxu1 %v189_v50  ;;  %v174_v13 = vld [vmem:[#allocation5 + $0x1c0] sm:$0xff]  ;;  %v239_v14 = vld [vmem:[#allocation5 + $0x3c8] sm:$0xff]  ;;  %v173_v15 = vld [vmem:[#allocation5 + $0x1b8] sm:$0xff] }
  0x44   :  { %377 = vmatprep.subr.mxu0 %v123_v51  ;;  %489 = vmatpush1.msra.mxu1 %v188_v52  ;;  %v238_v16 = vld [vmem:[#allocation5 + $0x3c0] sm:$0xff]  ;;  %v172_v17 = vld [vmem:[#allocation5 + $0x1b0] sm:$0xff]  ;;  %v237_v18 = vld [vmem:[#allocation5 + $0x3b8] sm:$0xff] }
  0x45   :  { %378 = vmatpush1.msra.mxu0 %v122_v53  ;;  %490 = vmatprep.subr.mxu1 %v187_v54  ;;  %v171_v19 = vld [vmem:[#allocation5 + $0x1a8] sm:$0xff]  ;;  %v236_v20 = vld [vmem:[#allocation5 + $0x3b0] sm:$0xff]  ;;  %v170_v21 = vld [vmem:[#allocation5 + $0x1a0] sm:$0xff] }
  0x46   :  { %379 = vmatprep.subr.mxu0 %v121_v55  ;;  %491 = vmatpush1.msra.mxu1 %v186_v56  ;;  %v235_v22 = vld [vmem:[#allocation5 + $0x3a8] sm:$0xff]  ;;  %v169_v23 = vld [vmem:[#allocation5 + $0x198] sm:$0xff]  ;;  %v234_v24 = vld [vmem:[#allocation5 + $0x3a0] sm:$0xff] }
  0x47   :  { %380 = vmatpush1.msra.mxu0 %v120_v57  ;;  %492 = vmatprep.subr.mxu1 %v185_v58  ;;  %v168_v25 = vld [vmem:[#allocation5 + $0x190] sm:$0xff]  ;;  %v233_v26 = vld [vmem:[#allocation5 + $0x398] sm:$0xff]  ;;  %v167_v27 = vld [vmem:[#allocation5 + $0x188] sm:$0xff] }
  0x48   :  { %381 = vmatprep.subr.mxu0 %v119_v59  ;;  %493 = vmatpush1.msra.mxu1 %v184_v60  ;;  %v232_v28 = vld [vmem:[#allocation5 + $0x390] sm:$0xff]  ;;  %v166_v29 = vld [vmem:[#allocation5 + $0x180] sm:$0xff]  ;;  %v231_v30 = vld [vmem:[#allocation5 + $0x388] sm:$0xff] }
  0x49   :  { %382 = vmatpush1.msra.mxu0 %v118_v61  ;;  %494 = vmatprep.subr.mxu1 %v183_v62  ;;  %v165_v31 = vld [vmem:[#allocation5 + $0x178] sm:$0xff]  ;;  %v230_v32 = vld [vmem:[#allocation5 + $0x380] sm:$0xff]  ;;  %v164_v33 = vld [vmem:[#allocation5 + $0x170] sm:$0xff] }
  0x4a   :  { %383 = vmatprep.subr.mxu0 %v181_v63  ;;  %495 = vmatpush1.msra.mxu1 %v182_v0  ;;  %v229_v34 = vld [vmem:[#allocation5 + $0x378] sm:$0xff]  ;;  %v163_v35 = vld [vmem:[#allocation5 + $0x168] sm:$0xff]  ;;  %v228_v36 = vld [vmem:[#allocation5 + $0x370] sm:$0xff] }
  0x4b   :  { %384 = vmatpush2.msra.mxu0 %v180_v1  ;;  %496 = vmatprep.subr.mxu1 %v245_v2  ;;  %v162_v37 = vld [vmem:[#allocation5 + $0x160] sm:$0xff]  ;;  %v227_v38 = vld [vmem:[#allocation5 + $0x368] sm:$0xff]  ;;  %v161_v39 = vld [vmem:[#allocation5 + $0x158] sm:$0xff] }
  0x4c   :  { %385 = vmatprep.subr.mxu0 %v179_v3  ;;  %497 = vmatpush2.msra.mxu1 %v244_v4  ;;  %v226_v40 = vld [vmem:[#allocation5 + $0x360] sm:$0xff]  ;;  %v160_v41 = vld [vmem:[#allocation5 + $0x150] sm:$0xff]  ;;  %v225_v42 = vld [vmem:[#allocation5 + $0x358] sm:$0xff] }
  0x4d   :  { %386 = vmatpush2.msra.mxu0 %v178_v5  ;;  %498 = vmatprep.subr.mxu1 %v243_v6  ;;  %v159_v43 = vld [vmem:[#allocation5 + $0x148] sm:$0xff]  ;;  %v224_v44 = vld [vmem:[#allocation5 + $0x350] sm:$0xff]  ;;  %v158_v45 = vld [vmem:[#allocation5 + $0x140] sm:$0xff] }
  0x4e   :  { %387 = vmatprep.subr.mxu0 %v177_v7  ;;  %499 = vmatpush2.msra.mxu1 %v242_v8  ;;  %v223_v46 = vld [vmem:[#allocation5 + $0x348] sm:$0xff]  ;;  %v157_v47 = vld [vmem:[#allocation5 + $0x138] sm:$0xff]  ;;  %v222_v48 = vld [vmem:[#allocation5 + $0x340] sm:$0xff] }
  0x4f   :  { %388 = vmatpush2.msra.mxu0 %v176_v9  ;;  %500 = vmatprep.subr.mxu1 %v241_v10  ;;  %v156_v49 = vld [vmem:[#allocation5 + $0x130] sm:$0xff]  ;;  %v221_v50 = vld [vmem:[#allocation5 + $0x338] sm:$0xff]  ;;  %v155_v51 = vld [vmem:[#allocation5 + $0x128] sm:$0xff] }
  0x50   :  { %389 = vmatprep.subr.mxu0 %v175_v11  ;;  %501 = vmatpush2.msra.mxu1 %v240_v12  ;;  %v220_v52 = vld [vmem:[#allocation5 + $0x330] sm:$0xff]  ;;  %v154_v53 = vld [vmem:[#allocation5 + $0x120] sm:$0xff]  ;;  %v219_v54 = vld [vmem:[#allocation5 + $0x328] sm:$0xff] }
  0x51   :  { %390 = vmatpush2.msra.mxu0 %v174_v13  ;;  %502 = vmatprep.subr.mxu1 %v239_v14  ;;  %v153_v55 = vld [vmem:[#allocation5 + $0x118] sm:$0xff]  ;;  %v218_v56 = vld [vmem:[#allocation5 + $0x320] sm:$0xff]  ;;  %v152_v57 = vld [vmem:[#allocation5 + $0x110] sm:$0xff] }
  0x52   :  { %391 = vmatprep.subr.mxu0 %v173_v15  ;;  %503 = vmatpush2.msra.mxu1 %v238_v16  ;;  %v217_v58 = vld [vmem:[#allocation5 + $0x318] sm:$0xff]  ;;  %v151_v59 = vld [vmem:[#allocation5 + $0x108] sm:$0xff]  ;;  %v150_v61 = vld [vmem:[#allocation5 + $0x100] sm:$0xff] }
  0x53   :  { %392 = vmatpush2.msra.mxu0 %v172_v17  ;;  %504 = vmatprep.subr.mxu1 %v237_v18  ;;  %v63_v60 = vld [vmem:[#allocation2 + $0x8] sm:$0xff]  ;;  %v216_v62 = vld [vmem:[#allocation5 + $0x310] sm:$0xff]  ;;  %v62_v63 = vld [vmem:[#allocation2] sm:$0xff] }
  0x54   :  { %393 = vmatprep.subr.mxu0 %v171_v19  ;;  %505 = vmatpush2.msra.mxu1 %v236_v20  ;;  %v215_v0 = vld [vmem:[#allocation5 + $0x308] sm:$0xff]  ;;  %v277_v1 = vld [vmem:[#allocation5 + $0x4f8] sm:$0xff]  ;;  %v214_v2 = vld [vmem:[#allocation5 + $0x300] sm:$0xff] }
  0x55   :  { %394 = vmatpush2.msra.mxu0 %v170_v21  ;;  %506 = vmatprep.subr.mxu1 %v235_v22  ;;  %v65_v3 = vld [vmem:[#allocation2 + $0x18] sm:$0xff]  ;;  %v276_v4 = vld [vmem:[#allocation5 + $0x4f0] sm:$0xff]  ;;  %v275_v6 = vld [vmem:[#allocation5 + $0x4e8] sm:$0xff] }
  0x56   :  { %395 = vmatprep.subr.mxu0 %v169_v23  ;;  %507 = vmatpush2.msra.mxu1 %v234_v24  ;;  %v64_v5 = vld [vmem:[#allocation2 + $0x10] sm:$0xff]  ;;  %v274_v7 = vld [vmem:[#allocation5 + $0x4e0] sm:$0xff]  ;;  %v273_v9 = vld [vmem:[#allocation5 + $0x4d8] sm:$0xff] }
  0x57   :  { %396 = vmatpush2.msra.mxu0 %v168_v25  ;;  %508 = vmatprep.subr.mxu1 %v233_v26  ;;  %v70_v8 = vld [vmem:[#allocation2 + $0x40] sm:$0xff]  ;;  %v313_v10 = vld [vmem:[#allocation5 + $0x618] sm:$0xff]  ;;  %v272_v11 = vld [vmem:[#allocation5 + $0x4d0] sm:$0xff] }
  0x58   :  { %397 = vmatprep.subr.mxu0 %v167_v27  ;;  %509 = vmatpush2.msra.mxu1 %v232_v28  ;;  %v312_v12 = vld [vmem:[#allocation5 + $0x610] sm:$0xff]  ;;  %v271_v13 = vld [vmem:[#allocation5 + $0x4c8] sm:$0xff]  ;;  %v69_v14 = vld [vmem:[#allocation2 + $0x38] sm:$0xff] }
  0x59   :  { %398 = vmatpush2.msra.mxu0 %v166_v29  ;;  %510 = vmatprep.subr.mxu1 %v231_v30  ;;  %v270_v15 = vld [vmem:[#allocation5 + $0x4c0] sm:$0xff]  ;;  %v72_v16 = vld [vmem:[#allocation2 + $0x50] sm:$0xff]  ;;  %v269_v17 = vld [vmem:[#allocation5 + $0x4b8] sm:$0xff] }
  0x5a   :  { %399 = vmatprep.subr.mxu0 %v165_v31  ;;  %511 = vmatpush2.msra.mxu1 %v230_v32  ;;  %v71_v18 = vld [vmem:[#allocation2 + $0x48] sm:$0xff]  ;;  %v268_v19 = vld [vmem:[#allocation5 + $0x4b0] sm:$0xff]  ;;  %v77_v20 = vld [vmem:[#allocation2 + $0x78] sm:$0xff] }
  0x5b   :  { %400 = vmatpush2.msra.mxu0 %v164_v33  ;;  %512 = vmatprep.subr.mxu1 %v229_v34  ;;  %v267_v21 = vld [vmem:[#allocation5 + $0x4a8] sm:$0xff]  ;;  %v76_v22 = vld [vmem:[#allocation2 + $0x70] sm:$0xff]  ;;  %v266_v23 = vld [vmem:[#allocation5 + $0x4a0] sm:$0xff] }
  0x5c   :  { %401 = vmatprep.subr.mxu0 %v163_v35  ;;  %513 = vmatpush2.msra.mxu1 %v228_v36  ;;  %v79_v24 = vld [vmem:[#allocation2 + $0x88] sm:$0xff]  ;;  %v265_v25 = vld [vmem:[#allocation5 + $0x498] sm:$0xff]  ;;  %v78_v26 = vld [vmem:[#allocation2 + $0x80] sm:$0xff] }
  0x5d   :  { %402 = vmatpush2.msra.mxu0 %v162_v37  ;;  %514 = vmatprep.subr.mxu1 %v227_v38  ;;  %v264_v27 = vld [vmem:[#allocation5 + $0x490] sm:$0xff]  ;;  %v263_v29 = vld [vmem:[#allocation5 + $0x488] sm:$0xff]  ;;  %v262_v31 = vld [vmem:[#allocation5 + $0x480] sm:$0xff] }
  0x5e   :  { %403 = vmatprep.subr.mxu0 %v161_v39  ;;  %515 = vmatpush2.msra.mxu1 %v226_v40  ;;  %v84_v28 = vld [vmem:[#allocation2 + $0xb0] sm:$0xff]  ;;  %v83_v30 = vld [vmem:[#allocation2 + $0xa8] sm:$0xff]  ;;  %v86_v32 = vld [vmem:[#allocation2 + $0xc0] sm:$0xff] }
  0x5f   :  { %404 = vmatpush2.msra.mxu0 %v160_v41  ;;  %516 = vmatprep.subr.mxu1 %v225_v42  ;;  %v261_v33 = vld [vmem:[#allocation5 + $0x478] sm:$0xff]  ;;  %v260_v35 = vld [vmem:[#allocation5 + $0x470] sm:$0xff]  ;;  %v91_v36 = vld [vmem:[#allocation2 + $0xe8] sm:$0xff] }
  0x60   :  { %405 = vmatprep.subr.mxu0 %v159_v43  ;;  %517 = vmatpush2.msra.mxu1 %v224_v44  ;;  %v85_v34 = vld [vmem:[#allocation2 + $0xb8] sm:$0xff]  ;;  %v259_v37 = vld [vmem:[#allocation5 + $0x468] sm:$0xff]  ;;  %v90_v38 = vld [vmem:[#allocation2 + $0xe0] sm:$0xff] }
  0x61   :  { %406 = vmatpush2.msra.mxu0 %v158_v45  ;;  %518 = vmatprep.subr.mxu1 %v223_v46  ;;  %v258_v39 = vld [vmem:[#allocation5 + $0x460] sm:$0xff]  ;;  %v93_v40 = vld [vmem:[#allocation2 + $0xf8] sm:$0xff]  ;;  %v92_v42 = vld [vmem:[#allocation2 + $0xf0] sm:$0xff] }
  0x62   :  { %407 = vmatprep.subr.mxu0 %v157_v47  ;;  %519 = vmatpush2.msra.mxu1 %v222_v48  ;;  %v257_v41 = vld [vmem:[#allocation5 + $0x458] sm:$0xff]  ;;  %v256_v43 = vld [vmem:[#allocation5 + $0x450] sm:$0xff]  ;;  %v98_v44 = vld [vmem:[#allocation2 + $0x120] sm:$0xff] }
  0x63   :  { %408 = vmatpush2.msra.mxu0 %v156_v49  ;;  %520 = vmatprep.subr.mxu1 %v221_v50  ;;  %v255_v45 = vld [vmem:[#allocation5 + $0x448] sm:$0xff]  ;;  %v254_v47 = vld [vmem:[#allocation5 + $0x440] sm:$0xff]  ;;  %v253_v49 = vld [vmem:[#allocation5 + $0x438] sm:$0xff] }
  0x64   :  { %409 = vmatprep.subr.mxu0 %v155_v51  ;;  %521 = vmatpush2.msra.mxu1 %v220_v52  ;;  %v311_v46 = vld [vmem:[#allocation5 + $0x608] sm:$0xff]  ;;  %v310_v48 = vld [vmem:[#allocation5 + $0x600] sm:$0xff]  ;;  %v97_v50 = vld [vmem:[#allocation2 + $0x118] sm:$0xff] }
  0x65   :  { %410 = vmatpush2.msra.mxu0 %v154_v53  ;;  %522 = vmatprep.subr.mxu1 %v219_v54  ;;  %v252_v51 = vld [vmem:[#allocation5 + $0x430] sm:$0xff]  ;;  %v251_v53 = vld [vmem:[#allocation5 + $0x428] sm:$0xff] }
  0x66   :  { %411 = vmatprep.subr.mxu0 %v153_v55  ;;  %523 = vmatpush2.msra.mxu1 %v218_v56  ;;  %v100_v52 = vld [vmem:[#allocation2 + $0x130] sm:$0xff]  ;;  %v99_v54 = vld [vmem:[#allocation2 + $0x128] sm:$0xff]  ;;  %v250_v55 = vld [vmem:[#allocation5 + $0x420] sm:$0xff] }
  0x67   :  { %412 = vmatpush2.msra.mxu0 %v152_v57  ;;  %524 = vmatprep.subr.mxu1 %v217_v58  ;;  %v105_v56 = vld [vmem:[#allocation2 + $0x158] sm:$0xff]  ;;  %v104_v58 = vld [vmem:[#allocation2 + $0x150] sm:$0xff] }
  0x68   :  { %413 = vmatprep.subr.mxu0 %v151_v59  ;;  %415 = vmatprep.mubr.f32.mxu0 %v63_v60  ;;  %v249_v57 = vld [vmem:[#allocation5 + $0x418] sm:$0xff]  ;;  %v248_v59 = vld [vmem:[#allocation5 + $0x410] sm:$0xff]  ;;  %v107_v60 = vld [vmem:[#allocation2 + $0x168] sm:$0xff] }
  0x69   :  { %414 = vmatpush2.msra.mxu0 %v150_v61  ;;  %525 = vmatpush2.msra.mxu1 %v216_v62  ;;  %v247_v61 = vld [vmem:[#allocation5 + $0x408] sm:$0xff]  ;;  %v106_v62 = vld [vmem:[#allocation2 + $0x160] sm:$0xff] }
  0x6a   :  { %416 = vmatmul.mubr.f32.vlgmr.msra.gmra.mxu0 %v62_v63  ;;  %526 = vmatprep.subr.mxu1 %v215_v0  ;;  %v246_v63 = vld [vmem:[#allocation5 + $0x400] sm:$0xff]  ;;  %v112_v0 = vld [vmem:[#allocation2 + $0x190] sm:$0xff] }
  0x6b   :  { %577 = vmatprep.subr.mxu0 %v277_v1  ;;  %527 = vmatpush2.msra.mxu1 %v214_v2  ;;  %v309_v1 = vld [vmem:[#allocation5 + $0x5f8] sm:$0xff]  ;;  %v111_v2 = vld [vmem:[#allocation2 + $0x188] sm:$0xff] }
  0x6c   :  { %528 = vmatprep.mubr.f32.mxu1 %v65_v3  ;;  %578 = vmatpush1.msra.mxu0 %v276_v4  ;;  %v308_v3 = vld [vmem:[#allocation5 + $0x5f0] sm:$0xff]  ;;  %v114_v4 = vld [vmem:[#allocation2 + $0x1a0] sm:$0xff] }
  0x6d   :  { %529 = vmatmul.mubr.f32.vlgmr.msra.gmra.mxu1 %v64_v5  ;;  %579 = vmatprep.subr.mxu0 %v275_v6  ;;  %v307_v5 = vld [vmem:[#allocation5 + $0x5e8] sm:$0xff]  ;;  %v113_v6 = vld [vmem:[#allocation2 + $0x198] sm:$0xff] }
  0x6e   :  { %580 = vmatpush1.msra.mxu0 %v274_v7  ;;  %421 = vmatprep.mubr.f32.mxu0 %v70_v8  ;;  %v306_v7 = vld [vmem:[#allocation5 + $0x5e0] sm:$0xff]  ;;  %v67_v8 = vld [vmem:[#allocation2 + $0x28] sm:$0xff] }
  0x6f   :  { %581 = vmatprep.subr.mxu0 %v273_v9  ;;  %718 = vmatprep.subr.mxu1 %v313_v10  ;;  %v305_v9 = vld [vmem:[#allocation5 + $0x5d8] sm:$0xff]  ;;  %v304_v10 = vld [vmem:[#allocation5 + $0x5d0] sm:$0xff] }
  0x70   :  { %582 = vmatpush1.msra.mxu0 %v272_v11  ;;  %719 = vmatpush1.msra.mxu1 %v312_v12  ;;  %v303_v11 = vld [vmem:[#allocation5 + $0x5c8] sm:$0xff]  ;;  %v68_v12 = vld [vmem:[#allocation2 + $0x30] sm:$0xff] }
  0x71   :  { %583 = vmatprep.subr.mxu0 %v271_v13  ;;  %422 = vmatmul.mubr.f32.gmra.mxu0 %v69_v14  ;;  %v302_v13 = vld [vmem:[#allocation5 + $0x5c0] sm:$0xff]  ;;  %v1288_v14 = vmov 0.0  }
  0x72   :  { %584 = vmatpush1.msra.mxu0 %v270_v15  ;;  %534 = vmatprep.mubr.f32.mxu1 %v72_v16  ;;  %v301_v15 = vld [vmem:[#allocation5 + $0x5b8] sm:$0xff]  ;;  %v300_v16 = vld [vmem:[#allocation5 + $0x5b0] sm:$0xff] }
  0x73   :  { %585 = vmatprep.subr.mxu0 %v269_v17  ;;  %535 = vmatmul.mubr.f32.gmra.mxu1 %v71_v18  ;;  %v299_v17 = vld [vmem:[#allocation5 + $0x5a8] sm:$0xff] }
  0x74   :  { %586 = vmatpush1.msra.mxu0 %v268_v19  ;;  %427 = vmatprep.mubr.f32.mxu0 %v77_v20  ;;  %v75_v18 = vld [vmem:[#allocation2 + $0x68] sm:$0xff]  ;;  %v298_v19 = vld [vmem:[#allocation5 + $0x5a0] sm:$0xff]  ;;  %v297_v20 = vld [vmem:[#allocation5 + $0x598] sm:$0xff] }
  0x75   :  { %587 = vmatprep.subr.mxu0 %v267_v21  ;;  %428 = vmatmul.mubr.f32.gmra.mxu0 %v76_v22  ;;  %v296_v21 = vld [vmem:[#allocation5 + $0x590] sm:$0xff]  ;;  %v295_v22 = vld [vmem:[#allocation5 + $0x588] sm:$0xff] }
  0x76   :  { %588 = vmatpush1.msra.mxu0 %v266_v23  ;;  %540 = vmatprep.mubr.f32.mxu1 %v79_v24  ;;  %v82_v23 = vld [vmem:[#allocation2 + $0xa0] sm:$0xff] }
  0x77   :  { %589 = vmatprep.subr.mxu0 %v265_v25  ;;  %541 = vmatmul.mubr.f32.gmra.mxu1 %v78_v26  ;;  %v294_v24 = vld [vmem:[#allocation5 + $0x580] sm:$0xff]  ;;  %v293_v25 = vld [vmem:[#allocation5 + $0x578] sm:$0xff]  ;;  %v292_v26 = vld [vmem:[#allocation5 + $0x570] sm:$0xff] }
  0x78   :  { %590 = vmatpush1.msra.mxu0 %v264_v27  ;;  %433 = vmatprep.mubr.f32.mxu0 %v84_v28  ;;  %v291_v27 = vld [vmem:[#allocation5 + $0x568] sm:$0xff]  ;;  %v89_v28 = vld [vmem:[#allocation2 + $0xd8] sm:$0xff] }
  0x79   :  { %591 = vmatprep.subr.mxu0 %v263_v29  ;;  %434 = vmatmul.mubr.f32.gmra.mxu0 %v83_v30  ;;  %v290_v29 = vld [vmem:[#allocation5 + $0x560] sm:$0xff]  ;;  %v289_v30 = vld [vmem:[#allocation5 + $0x558] sm:$0xff] }
  0x7a   :  { %592 = vmatpush1.msra.mxu0 %v262_v31  ;;  %546 = vmatprep.mubr.f32.mxu1 %v86_v32  ;;  %v288_v31 = vld [vmem:[#allocation5 + $0x550] sm:$0xff]  ;;  %v287_v32 = vld [vmem:[#allocation5 + $0x548] sm:$0xff] }
  0x7b   :  { %593 = vmatprep.subr.mxu0 %v261_v33  ;;  %547 = vmatmul.mubr.f32.gmra.mxu1 %v85_v34  ;;  %v96_v33 = vld [vmem:[#allocation2 + $0x110] sm:$0xff]  ;;  %v286_v34 = vld [vmem:[#allocation5 + $0x540] sm:$0xff] }
  0x7c   :  { %594 = vmatpush1.msra.mxu0 %v260_v35  ;;  %439 = vmatprep.mubr.f32.mxu0 %v91_v36  ;;  %v285_v35 = vld [vmem:[#allocation5 + $0x538] sm:$0xff]  ;;  %v284_v36 = vld [vmem:[#allocation5 + $0x530] sm:$0xff] }
  0x7d   :  { %595 = vmatprep.subr.mxu0 %v259_v37  ;;  %440 = vmatmul.mubr.f32.gmra.mxu0 %v90_v38  ;;  %v283_v37 = vld [vmem:[#allocation5 + $0x528] sm:$0xff] }
  0x7e   :  { %596 = vmatpush1.msra.mxu0 %v258_v39  ;;  %552 = vmatprep.mubr.f32.mxu1 %v93_v40  ;;  %v103_v38 = vld [vmem:[#allocation2 + $0x148] sm:$0xff]  ;;  %v282_v39 = vld [vmem:[#allocation5 + $0x520] sm:$0xff]  ;;  %v281_v40 = vld [vmem:[#allocation5 + $0x518] sm:$0xff] }
  0x7f   :  { %597 = vmatprep.subr.mxu0 %v257_v41  ;;  %553 = vmatmul.mubr.f32.gmra.mxu1 %v92_v42  ;;  %v280_v41 = vld [vmem:[#allocation5 + $0x510] sm:$0xff]  ;;  %v279_v42 = vld [vmem:[#allocation5 + $0x508] sm:$0xff] }
  0x80   :  { %598 = vmatpush1.msra.mxu0 %v256_v43  ;;  %445 = vmatprep.mubr.f32.mxu0 %v98_v44  ;;  %v110_v43 = vld [vmem:[#allocation2 + $0x180] sm:$0xff] }
  0x81   :  { %599 = vmatprep.subr.mxu0 %v255_v45  ;;  %720 = vmatprep.subr.mxu1 %v311_v46  ;;  %v278_v44 = vld [vmem:[#allocation5 + $0x500] sm:$0xff] }
  0x82   :  { %600 = vmatpush1.msra.mxu0 %v254_v47  ;;  %721 = vmatpush1.msra.mxu1 %v310_v48  ;;  %v66_v45 = vld [vmem:[#allocation2 + $0x20] sm:$0xff]  ;;  %v117_v47 = vld [vmem:[#allocation2 + $0x1b8] sm:$0xff] }
  0x83   :  { %601 = vmatprep.subr.mxu0 %v253_v49  ;;  %446 = vmatmul.mubr.f32.gmra.mxu0 %v97_v50  ;;  %v74_v46 = vld [vmem:[#allocation2 + $0x60] sm:$0xff]  ;;  %v73_v48 = vld [vmem:[#allocation2 + $0x58] sm:$0xff]  ;;  %v80_v50 = vld [vmem:[#allocation2 + $0x90] sm:$0xff] }
  0x84   :  { %602 = vmatpush1.msra.mxu0 %v252_v51  ;;  %558 = vmatprep.mubr.f32.mxu1 %v100_v52  ;;  %v81_v49 = vld [vmem:[#allocation2 + $0x98] sm:$0xff]  ;;  %v88_v51 = vld [vmem:[#allocation2 + $0xd0] sm:$0xff]  ;;  %v87_v52 = vld [vmem:[#allocation2 + $0xc8] sm:$0xff] }
  0x85   :  { %603 = vmatprep.subr.mxu0 %v251_v53  ;;  %559 = vmatmul.mubr.f32.gmra.mxu1 %v99_v54  ;;  %v95_v53 = vld [vmem:[#allocation2 + $0x108] sm:$0xff]  ;;  %v94_v54 = vld [vmem:[#allocation2 + $0x100] sm:$0xff] }
  0x86   :  { %604 = vmatpush1.msra.mxu0 %v250_v55  ;;  %451 = vmatprep.mubr.f32.mxu0 %v105_v56  ;;  %v102_v55 = vld [vmem:[#allocation2 + $0x140] sm:$0xff]  ;;  %v101_v56 = vld [vmem:[#allocation2 + $0x138] sm:$0xff] }
  0x87   :  { %605 = vmatprep.subr.mxu0 %v249_v57  ;;  %452 = vmatmul.mubr.f32.gmra.mxu0 %v104_v58  ;;  %v109_v57 = vld [vmem:[#allocation2 + $0x178] sm:$0xff]  ;;  %v108_v58 = vld [vmem:[#allocation2 + $0x170] sm:$0xff] }
  0x88   :  { %606 = vmatpush1.msra.mxu0 %v248_v59  ;;  %564 = vmatprep.mubr.f32.mxu1 %v107_v60  ;;  %v116_v59 = vld [vmem:[#allocation2 + $0x1b0] sm:$0xff]  ;;  %v115_v60 = vld [vmem:[#allocation2 + $0x1a8] sm:$0xff] }
  0x89   :  { %607 = vmatprep.subr.mxu0 %v247_v61  ;;  %565 = vmatmul.mubr.f32.gmra.mxu1 %v106_v62  ;;  %v914_v61 = vld [vmem:[#allocation7 + $0xf8] sm:$0xff] }
  0x8a   :  { %608 = vmatpush1.msra.mxu0 %v246_v63  ;;  %457 = vmatprep.mubr.f32.mxu0 %v112_v0  ;;  %v898_v62 = vld [vmem:[#allocation7 + $0x78] sm:$0xff]  ;;  %v913_v63 = vld [vmem:[#allocation7 + $0xf0] sm:$0xff] }
  0x8b   :  { %609 = vmatprep.subr.mxu0 %v309_v1  ;;  %458 = vmatmul.mubr.f32.gmra.mxu0 %v111_v2  ;;  %v897_v0 = vld [vmem:[#allocation7 + $0x70] sm:$0xff]  ;;  %v912_v1 = vld [vmem:[#allocation7 + $0xe8] sm:$0xff] }
  0x8c   :  { %610 = vmatpush2.msra.mxu0 %v308_v3  ;;  %570 = vmatprep.mubr.f32.mxu1 %v114_v4  ;;  %v896_v2 = vld [vmem:[#allocation7 + $0x68] sm:$0xff]  ;;  %v911_v3 = vld [vmem:[#allocation7 + $0xe0] sm:$0xff] }
  0x8d   :  { %611 = vmatprep.subr.mxu0 %v307_v5  ;;  %571 = vmatmul.mubr.f32.gmra.mxu1 %v113_v6  ;;  %v895_v4 = vld [vmem:[#allocation7 + $0x60] sm:$0xff]  ;;  %v910_v5 = vld [vmem:[#allocation7 + $0xd8] sm:$0xff] }
  0x8e   :  { %612 = vmatpush2.msra.mxu0 %v306_v7  ;;  %641 = vmatprep.mubr.f32.mxu0 %v67_v8  ;;  %v894_v6 = vld [vmem:[#allocation7 + $0x58] sm:$0xff]  ;;  %v909_v7 = vld [vmem:[#allocation7 + $0xd0] sm:$0xff] }
  0x8f   :  { %613 = vmatprep.subr.mxu0 %v305_v9  ;;  %754 = vmatprep.mubr.f32.mxu1 %v1288_v14  ;;  %v893_v8 = vld [vmem:[#allocation7 + $0x50] sm:$0xff]  ;;  %v908_v9 = vld [vmem:[#allocation7 + $0xc8] sm:$0xff] }
  0x90   :  { %614 = vmatpush2.msra.mxu0 %v304_v10  ;;  %1062 = vmatprep.subr.mxu1 %v914_v61  ;;  %v892_v10 = vld [vmem:[#allocation7 + $0x48] sm:$0xff] }
  0x91   :  { %615 = vmatprep.subr.mxu0 %v303_v11  ;;  %1053 = vmatmul.mubr.msk.f32.vlgmr.msra.gmra.mxu1 %vm326_vm0, %v68_v12  ;;  %v907_v11 = vld [vmem:[#allocation7 + $0xc0] sm:$0xff] }
  0x92   :  { %616 = vmatpush2.msra.mxu0 %v302_v13  ;;  %760 = vmatprep.mubr.f32.mxu1 %v1288_v14  ;;  %v891_v12 = vld [vmem:[#allocation7 + $0x40] sm:$0xff]  ;;  %v906_v13 = vld [vmem:[#allocation7 + $0xb8] sm:$0xff] }
  0x93   :  { %617 = vmatprep.subr.mxu0 %v301_v15  ;;  %1063 = vmatpush3.msra.mxu1 %v898_v62  ;;  %v905_v15 = vld [vmem:[#allocation7 + $0xb0] sm:$0xff] }
  0x94   :  { %618 = vmatpush2.msra.mxu0 %v300_v16  ;;  %1064 = vmatprep.subr.mxu1 %v913_v63  ;;  %v889_v16 = vld [vmem:[#allocation7 + $0x30] sm:$0xff] }
  0x95   :  { %619 = vmatprep.subr.mxu0 %v299_v17  ;;  %1054 = vmatmul.mubr.msk.f32.gmra.mxu1 %vm326_vm0, %v75_v18  ;;  %v904_v17 = vld [vmem:[#allocation7 + $0xa8] sm:$0xff] }
  0x96   :  { %620 = vmatpush2.msra.mxu0 %v298_v19  ;;  %766 = vmatprep.mubr.f32.mxu1 %v1288_v14  ;;  %v888_v18 = vld [vmem:[#allocation7 + $0x28] sm:$0xff]  ;;  %v903_v19 = vld [vmem:[#allocation7 + $0xa0] sm:$0xff] }
  0x97   :  { %621 = vmatprep.subr.mxu0 %v297_v20  ;;  %1065 = vmatpush3.msra.mxu1 %v897_v0  ;;  %v887_v20 = vld [vmem:[#allocation7 + $0x20] sm:$0xff] }
  0x98   :  { %622 = vmatpush2.msra.mxu0 %v296_v21  ;;  %1066 = vmatprep.subr.mxu1 %v912_v1  ;;  %v902_v21 = vld [vmem:[#allocation7 + $0x98] sm:$0xff]  ;;  %v314_v1 = vld [vmem:[%s1439_s2] sm:$0x3] }
  0x99   :  { %623 = vmatprep.subr.mxu0 %v295_v22  ;;  %1055 = vmatmul.mubr.msk.f32.gmra.mxu1 %vm326_vm0, %v82_v23  ;;  %v886_v22 = vld [vmem:[#allocation7 + $0x18] sm:$0xff]  ;;  %v901_v23 = vld [vmem:[#allocation7 + $0x90] sm:$0xff] }
  0x9a   :  { %624 = vmatpush2.msra.mxu0 %v294_v24  ;;  %772 = vmatprep.mubr.f32.mxu1 %v1288_v14  ;;  %v885_v24 = vld [vmem:[#allocation7 + $0x10] sm:$0xff] }
  0x9b   :  { %625 = vmatprep.subr.mxu0 %v293_v25  ;;  %1067 = vmatpush3.msra.mxu1 %v896_v2  ;;  %v900_v25 = vld [vmem:[#allocation7 + $0x88] sm:$0xff] }
  0x9c   :  { %626 = vmatpush2.msra.mxu0 %v292_v26  ;;  %1068 = vmatprep.subr.mxu1 %v911_v3  ;;  %v884_v26 = vld [vmem:[#allocation7 + $0x8] sm:$0xff] }
  0x9d   :  { %627 = vmatprep.subr.mxu0 %v291_v27  ;;  %1056 = vmatmul.mubr.msk.f32.gmra.mxu1 %vm326_vm0, %v89_v28  ;;  %v899_v27 = vld [vmem:[#allocation7 + $0x80] sm:$0xff] }
  0x9e   :  { %628 = vmatpush2.msra.mxu0 %v290_v29  ;;  %778 = vmatprep.mubr.f32.mxu1 %v1288_v14  ;;  %v883_v28 = vld [vmem:[#allocation7] sm:$0xff] }
  0x9f   :  { %629 = vmatprep.subr.mxu0 %v289_v30  ;;  %1069 = vmatpush3.msra.mxu1 %v895_v4 }
  0xa0   :  { %630 = vmatpush2.msra.mxu0 %v288_v31  ;;  %1070 = vmatprep.subr.mxu1 %v910_v5 }
  0xa1   :  { %631 = vmatprep.subr.mxu0 %v287_v32  ;;  %1057 = vmatmul.mubr.msk.f32.gmra.mxu1 %vm326_vm0, %v96_v33 }
  0xa2   :  { %632 = vmatpush2.msra.mxu0 %v286_v34  ;;  %784 = vmatprep.mubr.f32.mxu1 %v1288_v14 }
  0xa3   :  { %633 = vmatprep.subr.mxu0 %v285_v35  ;;  %1071 = vmatpush3.msra.mxu1 %v894_v6 }
  0xa4   :  { %634 = vmatpush2.msra.mxu0 %v284_v36  ;;  %1072 = vmatprep.subr.mxu1 %v909_v7 }
  0xa5   :  { %635 = vmatprep.subr.mxu0 %v283_v37  ;;  %1058 = vmatmul.mubr.msk.f32.gmra.mxu1 %vm326_vm0, %v103_v38 }
  0xa6   :  { %636 = vmatpush2.msra.mxu0 %v282_v39  ;;  %790 = vmatprep.mubr.f32.mxu1 %v1288_v14 }
  0xa7   :  { %637 = vmatprep.subr.mxu0 %v281_v40  ;;  %1073 = vmatpush3.msra.mxu1 %v893_v8 }
  0xa8   :  { %638 = vmatpush2.msra.mxu0 %v280_v41  ;;  %1074 = vmatprep.subr.mxu1 %v908_v9 }
  0xa9   :  { %639 = vmatprep.subr.mxu0 %v279_v42  ;;  %1059 = vmatmul.mubr.msk.f32.gmra.mxu1 %vm326_vm0, %v110_v43 }
  0xaa   :  { %640 = vmatpush2.msra.mxu0 %v278_v44  ;;  %796 = vmatprep.mubr.f32.mxu1 %v1288_v14  ;;  %v890_v14 = vld [vmem:[#allocation7 + $0x38] sm:$0xff] }
  0xab   :  { %642 = vmatmul.mubr.f32.vlgmr.msra.gmra.mxu0 %v66_v45  ;;  %1075 = vmatpush3.msra.mxu1 %v892_v10 }
  0xac   :  { %647 = vmatprep.mubr.f32.mxu0 %v74_v46  ;;  %1076 = vmatprep.subr.mxu1 %v907_v11 }
  0xad   :  { %1060 = vmatmul.mubr.msk.f32.gmra.mxu1 %vm326_vm0, %v117_v47 }
  0xae   :  { %1077 = vmatpush3.msra.mxu1 %v891_v12 }
  0xaf   :  { %648 = vmatmul.mubr.f32.gmra.mxu0 %v73_v48  ;;  %1078 = vmatprep.subr.mxu1 %v906_v13 }
  0xb0   :  { %653 = vmatprep.mubr.f32.mxu0 %v81_v49  ;;  %1079 = vmatpush3.msra.mxu1 %v890_v14 }
  0xb1   :  { %1080 = vmatprep.subr.mxu1 %v905_v15 }
  0xb2   :  { %1081 = vmatpush3.msra.mxu1 %v889_v16 }
  0xb3   :  { %654 = vmatmul.mubr.f32.gmra.mxu0 %v80_v50  ;;  %1082 = vmatprep.subr.mxu1 %v904_v17 }
  0xb4   :  { %659 = vmatprep.mubr.f32.mxu0 %v88_v51  ;;  %1083 = vmatpush3.msra.mxu1 %v888_v18 }
  0xb5   :  { %1084 = vmatprep.subr.mxu1 %v903_v19 }
  0xb6   :  { %1085 = vmatpush3.msra.mxu1 %v887_v20 }
  0xb7   :  { %660 = vmatmul.mubr.f32.gmra.mxu0 %v87_v52  ;;  %1086 = vmatprep.subr.mxu1 %v902_v21 }
  0xb8   :  { %665 = vmatprep.mubr.f32.mxu0 %v95_v53  ;;  %1087 = vmatpush3.msra.mxu1 %v886_v22 }
  0xb9   :  { %1088 = vmatprep.subr.mxu1 %v901_v23 }
  0xba   :  { %1089 = vmatpush3.msra.mxu1 %v885_v24 }
  0xbb   :  { %666 = vmatmul.mubr.f32.gmra.mxu0 %v94_v54  ;;  %1090 = vmatprep.subr.mxu1 %v900_v25 }
  0xbc   :  { %671 = vmatprep.mubr.f32.mxu0 %v102_v55  ;;  %1091 = vmatpush3.msra.mxu1 %v884_v26 }
  0xbd   :  { %1092 = vmatprep.subr.mxu1 %v899_v27 }
  0xbe   :  { %1093 = vmatpush3.msra.mxu1 %v883_v28 }
  0xbf   :  { %672 = vmatmul.mubr.f32.gmra.mxu0 %v101_v56 }
  0xc0   :  { %677 = vmatprep.mubr.f32.mxu0 %v109_v57 }
  0xc3   :  { %678 = vmatmul.mubr.f32.gmra.mxu0 %v108_v58  ;;  %v316_v58 = vlaneseq }
  0xc4   :  { %683 = vmatprep.mubr.f32.mxu0 %v116_v59 }
  0xc5   :  { %v317_v61 = vshrl.u32 %v316_v58, 7 }
  0xc7   :  { %684 = vmatmul.mubr.f32.gmra.mxu0 %v115_v60  ;;  %v318_v0 = vsub.s32 0, %v317_v61  ;;  %v322_v3 = vsub.s32 1, %v317_v61 }
  0xc9   :  { %v1385_v5 = vrot.slane %v314_v1, %v318_v0  ;;  %v1387_v7 = vrot.slane %v314_v1, %v322_v3 }
 0x12a   :  { %v417_v30 = vpop.f32.mrf.mxu0 }
 0x12b   :  { %v418_v9 = vadd.f32 %v417_v30, %v1385_v5 }
 0x12c   :  { %v419_v32 = vpop.f32.mrf.mxu0 }
 0x12d   :  { %v530_v29 = vpop.f32.mrf.mxu1  ;;  %v420_v11 = vadd.f32 %v419_v32, %v1387_v7 }
 0x12e   :  { %v531_v13 = vadd.f32 %v530_v29, %v418_v9 }
 0x12f   :  { %v532_v31 = vpop.f32.mrf.mxu1 }
 0x130   :  { %v533_v17 = vadd.f32 %v532_v31, %v420_v11 }
 0x131   :  { %v423_v34 = vpop.f32.mrf.mxu0 }
 0x132   :  { %v424_v14 = vadd.f32 %v423_v34, %v1385_v5 }
 0x133   :  { %v536_v33 = vpop.f32.mrf.mxu1  ;;  %v425_v37 = vpop.f32.mrf.mxu0 }
 0x134   :  { %v426_v18 = vadd.f32 %v425_v37, %v1387_v7  ;;  %v537_v21 = vadd.f32 %v536_v33, %v424_v14 }
 0x135   :  { %v538_v35 = vpop.f32.mrf.mxu1  ;;  %v429_v40 = vpop.f32.mrf.mxu0 }
 0x136   :  { %v430_v24 = vadd.f32 %v429_v40, %v1385_v5  ;;  %v539_v28 = vadd.f32 %v538_v35, %v426_v18 }
 0x137   :  { %v1348_v36 = vpop.f32.mrf.mxu1  ;;  %v431_v43 = vpop.f32.mrf.mxu0 }
 0x138   :  { %v432_v25 = vadd.f32 %v431_v43, %v1387_v7  ;;  %v543_v33 = vadd.f32 %v1348_v36, %v430_v24 }
 0x139   :  { %v1350_v38 = vpop.f32.mrf.mxu1  ;;  %v435_v45 = vpop.f32.mrf.mxu0 }
 0x13a   :  { %v436_v34 = vadd.f32 %v435_v45, %v1385_v5 }
 0x13b   :  { %v1352_v39 = vpop.f32.mrf.mxu1  ;;  %v437_v48 = vpop.f32.mrf.mxu0 }
 0x13c   :  { %v438_v40 = vadd.f32 %v437_v48, %v1387_v7  ;;  %v549_v9 = vadd.f32 %v1352_v39, %v436_v34 }
 0x13d   :  { %v1354_v41 = vpop.f32.mrf.mxu1  ;;  %v441_v51 = vpop.f32.mrf.mxu0 }
 0x13e   :  { %v442_v45 = vadd.f32 %v441_v51, %v1385_v5 }
 0x13f   :  { %v1356_v42 = vpop.f32.mrf.mxu1  ;;  %v1372_v54 = vpop.f32.mrf.mxu0 }
 0x140   :  { %v444_v48 = vadd.f32 %v1372_v54, %v1387_v7  ;;  %v555_v51 = vadd.f32 %v1356_v42, %v442_v45 }
 0x141   :  { %v1358_v44 = vpop.f32.mrf.mxu1 }
 0x142   :  { %v557_v54 = vadd.f32 %v1358_v44, %v444_v48 }
 0x143   :  { %v1374_v57 = vpop.f32.mrf.mxu0 }
 0x145   :  { %v1360_v46 = vpop.f32.mrf.mxu1  ;;  %v1376_v60 = vpop.f32.mrf.mxu0 }
 0x146   :  { %v450_v42 = vadd.f32 %v1376_v60, %v1387_v7 }
 0x147   :  { %v1362_v47 = vpop.f32.mrf.mxu1  ;;  %v1378_v63 = vpop.f32.mrf.mxu0 }
 0x149   :  { %v1364_v49 = vpop.f32.mrf.mxu1  ;;  %v1383_v4 = vpop.f32.mrf.mxu0 }
 0x14b   :  { %v1366_v50 = vpop.f32.mrf.mxu1  ;;  %v1389_v8 = vpop.f32.mrf.mxu0 }
 0x14d   :  { %v1368_v52 = vpop.f32.mrf.mxu1  ;;  %v1393_v12 = vpop.f32.mrf.mxu0 }
 0x14e   :  { %v462_v45 = vadd.f32 %v1393_v12, %v1387_v7 }
 0x14f   :  { %v1370_v53 = vpop.f32.mrf.mxu1 }
 0x150   :  { %v575_v12 = vadd.f32 %v1370_v53, %v462_v45 }
 0x151   :  { %v756_v55 = vpop.f32.mrf.mxu1 }
 0x153   :  { %v758_v56 = vpop.f32.mrf.mxu1 }
 0x155   :  { %v762_v59 = vpop.f32.mrf.mxu1 }
 0x157   :  { %v764_v62 = vpop.f32.mrf.mxu1 }
 0x159   :  { %v768_v2 = vpop.f32.mrf.mxu1 }
 0x15b   :  { %v770_v6 = vpop.f32.mrf.mxu1 }
 0x15d   :  { %v774_v10 = vpop.f32.mrf.mxu1 }
 0x15f   :  { %v776_v16 = vpop.f32.mrf.mxu1 }
 0x161   :  { %v780_v27 = vpop.f32.mrf.mxu1 }
 0x163   :  { %v782_v1 = vpop.f32.mrf.mxu1 }
 0x165   :  { %v786_v18 = vpop.f32.mrf.mxu1 }
 0x16b   :  { %v643_v15 = vpop.f32.mrf.mxu0 }
 0x16c   :  { %v644_v19 = vadd.f32 %v643_v15, %v531_v13 }
 0x16d   :  { %v645_v20 = vpop.f32.mrf.mxu0 }
 0x16e   :  { %v757_v22 = vadd.f32 %v756_v55, %v644_v19  ;;  %v646_v23 = vadd.f32 %v645_v20, %v533_v17  ;;  %v545_v55 = vadd.f32 %v1350_v38, %v432_v25  ;;  %v551_v38 = vadd.f32 %v1354_v41, %v438_v40 }
 0x16f   :  { %v649_v26 = vpop.f32.mrf.mxu0  ;;  %v448_v20 = vadd.f32 %v1374_v57, %v1385_v5  ;;  %v460_v40 = vadd.f32 %v1389_v8, %v1385_v5 }
 0x170   :  { %v803_v29 = vsub.f32 0.0, %v757_v22  ;;  %v759_v30 = vadd.f32 %v758_v56, %v646_v23  ;;  %v650_v32 = vadd.f32 %v649_v26, %v537_v21  ;;  %v788_v26 = vpop.f32.mrf.mxu1 }
 0x171   :  { %v651_v31 = vpop.f32.mrf.mxu0  ;;  %v561_v57 = vadd.f32 %v1360_v46, %v448_v20 }
 0x172   :  { %v819_v58 = vmul.f32 1.442695, %v803_v29  ;;  %v804_v37 = vsub.f32 0.0, %v759_v30  ;;  %v763_v61 = vadd.f32 %v762_v59, %v650_v32  ;;  %v652_v0 = vadd.f32 %v651_v31, %v539_v28 }
 0x173   :  { %v655_v43 = vpop.f32.mrf.mxu0  ;;  %v454_v32 = vadd.f32 %v1378_v63, %v1385_v5 }
 0x174   :  { %1129 = vpow2.f32 %v819_v58  ;;  %v821_v35 = vmul.f32 1.442695, %v804_v37  ;;  %v805_v3 = vsub.f32 0.0, %v763_v61  ;;  %v765_v56 = vadd.f32 %v764_v62, %v652_v0  ;;  %v792_v61 = vpop.f32.mrf.mxu1 }
 0x175   :  { %v656_v11 = vadd.f32 %v655_v43, %v543_v33  ;;  %v657_v13 = vpop.f32.mrf.mxu0  ;;  %v456_v58 = vadd.f32 %v1383_v4, %v1387_v7  ;;  %v567_v63 = vadd.f32 %v1364_v49, %v454_v32 }
 0x176   :  { %1131 = vpow2.f32 %v821_v35  ;;  %v823_v59 = vmul.f32 1.442695, %v805_v3  ;;  %v806_v14 = vsub.f32 0.0, %v765_v56  ;;  %v658_v36 = vadd.f32 %v657_v13, %v545_v55 }
 0x177   :  { %v769_v15 = vadd.f32 %v768_v2, %v656_v11  ;;  %v661_v17 = vpop.f32.mrf.mxu0  ;;  %v563_v55 = vadd.f32 %v1362_v47, %v450_v42 }
 0x178   :  { %1133 = vpow2.f32 %v823_v59  ;;  %v825_v62 = vmul.f32 1.442695, %v806_v14  ;;  %v771_v19 = vadd.f32 %v770_v6, %v658_v36  ;;  %v662_v39 = vadd.f32 %v661_v17, %v549_v9  ;;  %v794_v59 = vpop.f32.mrf.mxu1 }
 0x179   :  { %v807_v21 = vsub.f32 0.0, %v769_v15  ;;  %v663_v22 = vpop.f32.mrf.mxu0  ;;  %v569_v9 = vadd.f32 %v1366_v50, %v456_v58 }
 0x17a   :  { %1135 = vpow2.f32 %v825_v62  ;;  %v808_v23 = vsub.f32 0.0, %v771_v19  ;;  %v775_v41 = vadd.f32 %v774_v10, %v662_v39  ;;  %v664_v24 = vadd.f32 %v663_v22, %v551_v38  ;;  %v798_v39 = vpop.f32.mrf.mxu1 }
 0x17b   :  { %v827_v2 = vmul.f32 1.442695, %v807_v21  ;;  %v667_v25 = vpop.f32.mrf.mxu0 }
 0x17c   :  { %v829_v28 = vmul.f32 1.442695, %v808_v23  ;;  %v809_v29 = vsub.f32 0.0, %v775_v41  ;;  %v777_v6 = vadd.f32 %v776_v16, %v664_v24  ;;  %v668_v30 = vadd.f32 %v667_v25, %v555_v51 }
 0x17d   :  { %1137 = vpow2.f32 %v827_v2  ;;  %v669_v10 = vpop.f32.mrf.mxu0 }
 0x17e   :  { %1139 = vpow2.f32 %v829_v28  ;;  %v831_v34 = vmul.f32 1.442695, %v809_v29  ;;  %v810_v44 = vsub.f32 0.0, %v777_v6  ;;  %v781_v31 = vadd.f32 %v780_v27, %v668_v30  ;;  %v800_v28 = vpop.f32.mrf.mxu1 }
 0x17f   :  { %v670_v37 = vadd.f32 %v669_v10, %v557_v54  ;;  %v673_v16 = vpop.f32.mrf.mxu0 }
 0x180   :  { %1141 = vpow2.f32 %v831_v34  ;;  %v833_v0 = vmul.f32 1.442695, %v810_v44  ;;  %v811_v60 = vsub.f32 0.0, %v781_v31  ;;  %v674_v33 = vadd.f32 %v673_v16, %v561_v57 }
 0x181   :  { %v1130_v46 = vpop.eup %1129  ;;  %v783_v43 = vadd.f32 %v782_v1, %v670_v37  ;;  %v675_v27 = vpop.f32.mrf.mxu0  ;;  %v573_v1 = vadd.f32 %v1368_v52, %v460_v40 }
 0x182   :  { %v851_v35 = vadd.f32 1.0, %v1130_v46  ;;  %1143 = vpow2.f32 %v833_v0  ;;  %v835_v4 = vmul.f32 1.442695, %v811_v60  ;;  %v787_v3 = vadd.f32 %v786_v18, %v674_v33 }
 0x183   :  { %v1132_v56 = vpop.eup %1131  ;;  %v812_v11 = vsub.f32 0.0, %v783_v43  ;;  %v676_v13 = vadd.f32 %v675_v27, %v563_v55  ;;  %v679_v47 = vpop.f32.mrf.mxu0 }
 0x184   :  { %1145 = vrcp.f32 %v851_v35  ;;  %v852_v49 = vadd.f32 1.0, %v1132_v56  ;;  %v813_v14 = vsub.f32 0.0, %v787_v3  ;;  %v680_v5 = vadd.f32 %v679_v47, %v567_v63 }
 0x185   :  { %v1134_v8 = vpop.eup %1133  ;;  %1147 = vpow2.f32 %v835_v4  ;;  %v837_v36 = vmul.f32 1.442695, %v812_v11  ;;  %v789_v38 = vadd.f32 %v788_v26, %v676_v13  ;;  %v681_v48 = vpop.f32.mrf.mxu0 }
 0x186   :  { %1149 = vrcp.f32 %v852_v49  ;;  %v853_v50 = vadd.f32 1.0, %v1134_v8  ;;  %v839_v15 = vmul.f32 1.442695, %v813_v14  ;;  %v793_v17 = vadd.f32 %v792_v61, %v680_v5 }
 0x187   :  { %v1136_v7 = vpop.eup %1135  ;;  %1151 = vpow2.f32 %v837_v36  ;;  %v814_v18 = vsub.f32 0.0, %v789_v38  ;;  %v682_v62 = vadd.f32 %v681_v48, %v569_v9  ;;  %v685_v19 = vpop.f32.mrf.mxu0 }
 0x188   :  { %1153 = vrcp.f32 %v853_v50  ;;  %v854_v51 = vadd.f32 1.0, %v1136_v7  ;;  %v815_v20 = vsub.f32 0.0, %v793_v17  ;;  %v686_v52 = vadd.f32 %v685_v19, %v573_v1  ;;  %v1061_v7 = vld [vmem:[%s1441_s4] ss:$0 sm:$0xff]  ;;  %s1289_s4 = smov [#allocation8]  }
 0x189   :  { %1155 = vpow2.f32 %v839_v15  ;;  %v841_v21 = vmul.f32 1.442695, %v814_v18  ;;  %v795_v22 = vadd.f32 %v794_v59, %v682_v62  ;;  %v687_v23 = vpop.f32.mrf.mxu0  ;;  %s1040_s14 = sshll.u32 %s1289_s4, 4  ;;  %s1041_s14 = int_to_ptr.vmem [resolvable:$true] %s1040_s14 }
 0x18a   :  { %v1138_v41 = vpop.eup %1137  ;;  %1157 = vrcp.f32 %v854_v51  ;;  %v843_v24 = vmul.f32 1.442695, %v815_v20  ;;  %v799_v54 = vadd.f32 %v798_v39, %v686_v52  ;;  %v688_v2 = vadd.f32 %v687_v23, %v575_v12  ;;  %s1253_s15 = scalar_lea.vmem %s1041_s14, 1024  ;;  %p1258_p2 = scmp.lt.s32.totalorder %s1041_s14, %s1041_s14 }
 0x18b   :  { %v1140_v25 = vpop.eup %1139  ;;  %v855_v53 = vadd.f32 1.0, %v1138_v41  ;;  %1159 = vpow2.f32 %v841_v21  ;;  %v816_v26 = vsub.f32 0.0, %v795_v22  ;;  %p1254_p1 = scmp.ne.s32.totalorder %s1041_s14, %s1253_s15  ;;  %p1259_p3 = scmp.lt.s32.totalorder %s1253_s15, %s1253_s15 }
 0x18c   :  { %v856_v29 = vadd.f32 1.0, %v1140_v25  ;;  %1161 = vpow2.f32 %v843_v24  ;;  %v817_v6 = vsub.f32 0.0, %v799_v54  ;;  %v801_v30 = vadd.f32 %v800_v28, %v688_v2 }
 0x18d   :  { %v1142_v42 = vpop.eup %1141  ;;  %1163 = vrcp.f32 %v855_v53  ;;  %v845_v57 = vmul.f32 1.442695, %v816_v26  ;;  %p1260_p4 = por %p1259_p3, %p1258_p2 }
 0x18e   :  { %1165 = vrcp.f32 %v856_v29  ;;  %v857_v32 = vadd.f32 1.0, %v1142_v42  ;;  %v847_v10 = vmul.f32 1.442695, %v817_v6  ;;  %v818_v34 = vsub.f32 0.0, %v801_v30 }
 0x18f   :  { %v1144_v44 = vpop.eup %1143  ;;  %1167 = vpow2.f32 %v845_v57  ;;  %p1261_p5 = pnand %p1260_p4, %p1254_p1 }
 0x190   :  { %1169 = vrcp.f32 %v857_v32  ;;  %v858_v31 = vadd.f32 1.0, %v1144_v44  ;;  %v849_v58 = vmul.f32 1.442695, %v818_v34 }
 0x191   :  { %v1146_v37 = vpop.eup %1145  ;;  %1171 = vpow2.f32 %v847_v10 }
 0x192   :  { %v1148_v16 = vpop.eup %1147  ;;  %1173 = vrcp.f32 %v858_v31 }
 0x193   :  { %v1150_v61 = vpop.eup %1149  ;;  %1175 = vpow2.f32 %v849_v58  ;;  %v859_v60 = vadd.f32 1.0, %v1148_v16 }
 0x194   :  { %v1152_v0 = vpop.eup %1151  ;;  %986 = vmatprep.mubr.f32.mxu1 %v1150_v61 }
 0x195   :  { %v1154_v33 = vpop.eup %1153  ;;  %v860_v46 = vadd.f32 1.0, %v1152_v0  ;;  %987 = vmatmul.mubr.f32.vlgmr.msra.gmra.mxu1 %v1146_v37 }
 0x196   :  { %v1156_v55 = vpop.eup %1155 }
 0x197   :  { %v1158_v63 = vpop.eup %1157  ;;  %1177 = vrcp.f32 %v860_v46  ;;  %v861_v43 = vadd.f32 1.0, %v1156_v55 }
 0x198   :  { %v1160_v40 = vpop.eup %1159  ;;  %1179 = vrcp.f32 %v859_v60  ;;  %991 = vmatprep.mubr.f32.mxu1 %v1158_v63 }
 0x199   :  { %v1162_v27 = vpop.eup %1161  ;;  %v862_v35 = vadd.f32 1.0, %v1160_v40  ;;  %992 = vmatmul.mubr.f32.gmra.mxu1 %v1154_v33 }
 0x19a   :  { %v1164_v4 = vpop.eup %1163  ;;  %v863_v9 = vadd.f32 1.0, %v1162_v27 }
 0x19b   :  { %v1166_v3 = vpop.eup %1165  ;;  %1181 = vrcp.f32 %v862_v35 }
 0x19c   :  { %v1168_v56 = vpop.eup %1167  ;;  %1183 = vrcp.f32 %v861_v43  ;;  %996 = vmatprep.mubr.f32.mxu1 %v1166_v3 }
 0x19d   :  { %v1170_v45 = vpop.eup %1169  ;;  %v864_v11 = vadd.f32 1.0, %v1168_v56  ;;  %997 = vmatmul.mubr.f32.gmra.mxu1 %v1164_v4 }
 0x19e   :  { %v1172_v13 = vpop.eup %1171 }
 0x19f   :  { %v1174_v47 = vpop.eup %1173  ;;  %1185 = vrcp.f32 %v864_v11  ;;  %v865_v49 = vadd.f32 1.0, %v1172_v13 }
 0x1a0   :  { %v1176_v59 = vpop.eup %1175  ;;  %1187 = vrcp.f32 %v863_v9  ;;  %1001 = vmatprep.mubr.f32.mxu1 %v1174_v47 }
 0x1a1   :  { %v866_v14 = vadd.f32 1.0, %v1176_v59  ;;  %1002 = vmatmul.mubr.f32.gmra.mxu1 %v1170_v45 }
 0x1a3   :  { %1189 = vrcp.f32 %v866_v14 }
 0x1a4   :  { %v1178_v5 = vpop.eup %1177  ;;  %1191 = vrcp.f32 %v865_v49 }
 0x1a5   :  { %v1180_v8 = vpop.eup %1179  ;;  %1006 = vmatprep.mubr.f32.mxu1 %v1178_v5 }
 0x1a6   :  { %1007 = vmatmul.mubr.f32.gmra.mxu1 %v1180_v8 }
 0x1a8   :  { %v1182_v1 = vpop.eup %1181 }
 0x1a9   :  { %v1184_v36 = vpop.eup %1183  ;;  %1011 = vmatprep.mubr.f32.mxu1 %v1182_v1 }
 0x1aa   :  { %1012 = vmatmul.mubr.f32.gmra.mxu1 %v1184_v36 }
 0x1ac   :  { %v1186_v38 = vpop.eup %1185 }
 0x1ad   :  { %v1188_v48 = vpop.eup %1187  ;;  %1016 = vmatprep.mubr.f32.mxu1 %v1186_v38 }
 0x1ae   :  { %1017 = vmatmul.mubr.f32.gmra.mxu1 %v1188_v48 }
 0x1b0   :  { %v1190_v50 = vpop.eup %1189 }
 0x1b1   :  { %v1192_v15 = vpop.eup %1191  ;;  %1021 = vmatprep.mubr.f32.mxu1 %v1190_v50 }
 0x1b2   :  { %1022 = vmatmul.mubr.f32.gmra.mxu1 %v1192_v15 }
 0x255   :  { %v1094_v17 = vpop.f32.mrf.mxu1 }
 0x257   :  { %v1095_v12 = vpop.f32.mrf.mxu1 }
 0x258   :  { %v1096_v18 = vadd.f32 %v1095_v12, %v1094_v17 }
 0x259   :  { %v1097_v62 = vpop.f32.mrf.mxu1 }
 0x25a   :  { %v989_v19 = vadd.f32 %v1096_v18, %v1061_v7 }
 0x25b   :  { %v1098_v39 = vpop.f32.mrf.mxu1 }
 0x25c   :  { %1027 = vst [vmem:[#allocation8] sm:$0xff] %v989_v19  ;;  %v1099_v51 = vadd.f32 %v1098_v39, %v1097_v62 }
 0x25d   :  { %v1100_v20 = vpop.f32.mrf.mxu1 }
 0x25e   :  { %v994_v52 = vadd.f32 %v1099_v51, %v1061_v7 }
 0x25f   :  { %v1101_v21 = vpop.f32.mrf.mxu1 }
 0x260   :  { %1028 = vst [vmem:[#allocation8 + $0x8] sm:$0xff] %v994_v52  ;;  %v1102_v22 = vadd.f32 %v1101_v21, %v1100_v20 }
 0x261   :  { %v1103_v23 = vpop.f32.mrf.mxu1 }
 0x262   :  { %v999_v41 = vadd.f32 %v1102_v22, %v1061_v7 }
 0x263   :  { %v1104_v24 = vpop.f32.mrf.mxu1 }
 0x264   :  { %1029 = vst [vmem:[#allocation8 + $0x10] sm:$0xff] %v999_v41  ;;  %v1105_v54 = vadd.f32 %v1104_v24, %v1103_v23 }
 0x266   :  { %v1004_v2 = vadd.f32 %v1105_v54, %v1061_v7  ;;  %v1106_v25 = vpop.f32.mrf.mxu1 }
 0x268   :  { %1030 = vst [vmem:[#allocation8 + $0x18] sm:$0xff] %v1004_v2  ;;  %v1107_v53 = vpop.f32.mrf.mxu1 }
 0x269   :  { %v1108_v26 = vadd.f32 %v1107_v53, %v1106_v25 }
 0x26a   :  { %v1109_v28 = vpop.f32.mrf.mxu1 }
 0x26b   :  { %v1009_v29 = vadd.f32 %v1108_v26, %v1061_v7 }
 0x26c   :  { %v1110_v6 = vpop.f32.mrf.mxu1 }
 0x26d   :  { %1031 = vst [vmem:[#allocation8 + $0x20] sm:$0xff] %v1009_v29  ;;  %v1111_v30 = vadd.f32 %v1110_v6, %v1109_v28 }
 0x26e   :  { %v1112_v42 = vpop.f32.mrf.mxu1 }
 0x26f   :  { %v1014_v57 = vadd.f32 %v1111_v30, %v1061_v7 }
 0x270   :  { %v1113_v32 = vpop.f32.mrf.mxu1 }
 0x271   :  { %1032 = vst [vmem:[#allocation8 + $0x28] sm:$0xff] %v1014_v57  ;;  %v1114_v10 = vadd.f32 %v1113_v32, %v1112_v42 }
 0x272   :  { %v1115_v34 = vpop.f32.mrf.mxu1 }
 0x273   :  { %v1019_v44 = vadd.f32 %v1114_v10, %v1061_v7 }
 0x274   :  { %v1116_v31 = vpop.f32.mrf.mxu1 }
 0x275   :  { %1033 = vst [vmem:[#allocation8 + $0x30] sm:$0xff] %v1019_v44  ;;  %v1117_v58 = vadd.f32 %v1116_v31, %v1115_v34 }
 0x277   :  { %v1024_v37 = vadd.f32 %v1117_v58, %v1061_v7 }
 0x279   :  { %1034 = vst [vmem:[#allocation8 + $0x38] sm:$0xff] %v1024_v37 }
 0x27a   :  { %1264 = shalt.err (!%p1261_p5)
}
 0x27b   :  { %1046 = dma.vmem_to_hbm [thread:$0]  %s1041_s14, 1024, %s1442_s5, [#allocation4], %s1286_s9, %s1286_s9, %s1287_s10  }
 0x27c   :  { %1277 = dma.done.wait [#allocation4], 1024  }
 0x27d   :  { %1278 = vsyncadd [#allocation4], 4294966272 }
 0x27e   :  { %1050 = vsyncpa [#allocation3], 1 }
 0x27f   :  { %1051 = vsyncpa [#allocation6], 1 }
 0x280   :  { %1052 = vsyncpa [#allocation4], 1 }

</bundles_post_ra>
